<compile_context>
chip_gen: v7x
topology: tpu7x:2x2x1
jax: 0.10.0
libtpu: 0.0.40
codegen_flags: <defaults>
</compile_context>

<pallas_src>
import functools
import math

import jax
import jax.numpy as jnp
from jax.experimental import pallas as pl
from jax.experimental.pallas import tpu as pltpu


def _round_up(a, b):
    return (a + b - 1) // b * b


def _cdiv(a, b):
    return -(-a // b)


# ------------------------------------------------------------------
# Fused single-pass kernel: pool + MLP + sigmoid + scale, Nb images per step.
# ------------------------------------------------------------------
def _ca_fused_kernel(x_ref, w1t_ref, b1_ref, w2_ref, b2_ref, o_ref, *, inv_hw):
    # x_ref/o_ref: (Nb, C, HWp).  w1t: (C, Cr), b1: (1, Cr), w2: (C, Cr), b2: (C, 1).
    # Global average pool over spatial positions (lane reduce -> XLU); accumulate in f32.
    s = jnp.sum(x_ref[...].astype(jnp.float32), axis=2, keepdims=True) * inv_hw  # (Nb,C,1)

    # Squeeze 1x1 conv C -> Cr + ReLU: broadcast-multiply + sublane reduce (no MXU).
    t1 = jnp.sum(w1t_ref[...][None] * s, axis=1, keepdims=True) + b1_ref[...][None]  # (Nb,1,Cr)
    t1 = jnp.maximum(t1, 0.0)

    # Excite 1x1 conv Cr -> C: broadcast-multiply + lane reduce.
    t2 = jnp.sum(w2_ref[...][None] * t1, axis=2, keepdims=True) + b2_ref[...][None]  # (Nb,C,1)

    # Sigmoid gate: exp and approx reciprocal both land on the EUP slot.
    y = pl.reciprocal(1.0 + jnp.exp(-t2), approx=True)                               # (Nb,C,1)

    # Re-read x (don't hold the large tile live across the gate math); fused store.
    o_ref[...] = (x_ref[...].astype(jnp.float32) * y).astype(o_ref.dtype)


# ------------------------------------------------------------------
# Strip-mined two-pass kernels (large images / v7x 64 MiB VMEM).
# ------------------------------------------------------------------
def _pool_kernel(x_ref, s_ref):
    # x_ref: (1, C, Ts) strip; s_ref: (1, C, 1) f32 accumulator resident across strips.
    @pl.when(pl.program_id(1) == 0)
    def _():
        s_ref[...] = jnp.zeros_like(s_ref)

    s_ref[...] += jnp.sum(x_ref[...].astype(jnp.float32), axis=2, keepdims=True)


def _scale_kernel(s_ref, w1t_ref, b1_ref, w2_ref, b2_ref, x_ref, o_ref, *, inv_hw):
    # s_ref: (1, C, 1) pooled sums (f32).  Gate recomputed per strip (tiny), then fused scale.
    s = s_ref[0] * inv_hw                                                    # (C, 1)
    t1 = jnp.sum(w1t_ref[...] * s, axis=0, keepdims=True) + b1_ref[...]      # (1, Cr)
    t1 = jnp.maximum(t1, 0.0)
    t2 = jnp.sum(w2_ref[...] * t1, axis=1, keepdims=True) + b2_ref[...]      # (C, 1)
    y = pl.reciprocal(1.0 + jnp.exp(-t2), approx=True)                       # (C, 1)
    o_ref[0] = (x_ref[0].astype(jnp.float32) * y).astype(o_ref.dtype)


# ------------------------------------------------------------------
# Wrappers.
# ------------------------------------------------------------------
def _ca_layer_fused(x2d, w1t, b1r, w2f, b2c, inv_hw, block_bytes_target, max_block_bytes):
    N, C, HW = x2d.shape
    Cr = w1t.shape[1]
    itemsize = jnp.dtype(x2d.dtype).itemsize

    # Keep the lane (spatial) axis a multiple of 128 so stores are unmasked vst.
    HW_pad = _round_up(HW, 128)
    if HW_pad != HW:
        x2d = jnp.pad(x2d, ((0, 0), (0, 0), (0, HW_pad - HW)))

    per_image = C * HW_pad * itemsize
    nb = max(1, min(block_bytes_target // per_image, max_block_bytes // per_image))
    if N >= 2:
        nb = min(nb, _cdiv(N, 2))   # keep >= 2 grid steps so both v7x TCs get work
    nb = max(1, min(nb, N))

    N_pad = _round_up(N, nb)
    if N_pad != N:
        x2d = jnp.pad(x2d, ((0, N_pad - N), (0, 0), (0, 0)))

    blk_bytes = nb * per_image
    wt_bytes = 4 * (2 * C * Cr + Cr + C)
    vmem_limit = int(min(max(4 * blk_bytes + 4 * wt_bytes + (4 << 20), 32 << 20), 48 << 20))

    kernel = functools.partial(_ca_fused_kernel, inv_hw=inv_hw)
    out = pl.pallas_call(
        kernel,
        out_shape=jax.ShapeDtypeStruct((N_pad, C, HW_pad), x2d.dtype),
        grid_spec=pltpu.PrefetchScalarGridSpec(
            num_scalar_prefetch=0,
            grid=(N_pad // nb,),
            in_specs=[
                pl.BlockSpec((nb, C, HW_pad), lambda i: (i, 0, 0)),   # x, Nb images per step
                pl.BlockSpec((C, Cr), lambda i: (0, 0)),              # w1^T
                pl.BlockSpec((1, Cr), lambda i: (0, 0)),              # b1
                pl.BlockSpec((C, Cr), lambda i: (0, 0)),              # w2
                pl.BlockSpec((C, 1), lambda i: (0, 0)),               # b2
            ],
            out_specs=pl.BlockSpec((nb, C, HW_pad), lambda i: (i, 0, 0)),
        ),
        compiler_params=pltpu.CompilerParams(
            dimension_semantics=("parallel",),
            vmem_limit_bytes=vmem_limit),
    )(x2d, w1t, b1r, w2f, b2c)

    return out[:N, :, :HW]


def _ca_layer_strips(x2d, w1t, b1r, w2f, b2c, inv_hw, max_block_bytes):
    N, C, HW = x2d.shape
    Cr = w1t.shape[1]
    itemsize = jnp.dtype(x2d.dtype).itemsize

    strip_bytes = min(4 << 20, max_block_bytes)
    ts = max(128, (strip_bytes // (C * itemsize)) // 128 * 128)
    ts = min(ts, _round_up(HW, 128))
    HW_pad = _round_up(HW, ts)
    if HW_pad != HW:
        x2d = jnp.pad(x2d, ((0, 0), (0, 0), (0, HW_pad - HW)))
    n_strips = HW_pad // ts

    blk = C * ts * itemsize
    vmem_limit = int(min(max(4 * blk + (4 << 20), 32 << 20), 48 << 20))

    # Pass 1: per-channel spatial sums accumulated across strips (strip axis "arbitrary").
    sums = pl.pallas_call(
        _pool_kernel,
        out_shape=jax.ShapeDtypeStruct((N, C, 1), jnp.float32),
        grid_spec=pltpu.PrefetchScalarGridSpec(
            num_scalar_prefetch=0,
            grid=(N, n_strips),
            in_specs=[pl.BlockSpec((1, C, ts), lambda n, s: (n, 0, s))],
            out_specs=pl.BlockSpec((1, C, 1), lambda n, s: (n, 0, 0)),
        ),
        compiler_params=pltpu.CompilerParams(
            dimension_semantics=("parallel", "arbitrary"),
            vmem_limit_bytes=vmem_limit),
    )(x2d)

    # Pass 2: tiny gate MLP + sigmoid fused with the elementwise scale over strips.
    kernel = functools.partial(_scale_kernel, inv_hw=inv_hw)
    out = pl.pallas_call(
        kernel,
        out_shape=jax.ShapeDtypeStruct((N, C, HW_pad), x2d.dtype),
        grid_spec=pltpu.PrefetchScalarGridSpec(
            num_scalar_prefetch=0,
            grid=(N, n_strips),
            in_specs=[
                pl.BlockSpec((1, C, 1), lambda n, s: (n, 0, 0)),      # pooled sums
                pl.BlockSpec((C, Cr), lambda n, s: (0, 0)),           # w1^T
                pl.BlockSpec((1, Cr), lambda n, s: (0, 0)),           # b1
                pl.BlockSpec((C, Cr), lambda n, s: (0, 0)),           # w2
                pl.BlockSpec((C, 1), lambda n, s: (0, 0)),            # b2
                pl.BlockSpec((1, C, ts), lambda n, s: (n, 0, s)),     # x strip
            ],
            out_specs=pl.BlockSpec((1, C, ts), lambda n, s: (n, 0, s)),
        ),
        compiler_params=pltpu.CompilerParams(
            dimension_semantics=("parallel", "parallel"),
            vmem_limit_bytes=vmem_limit),
    )(sums, w1t, b1r, w2f, b2c, x2d)

    return out[:, :, :HW]


def ca_layer(x_nchw, w1, b1, w2, b2, *,
             block_bytes_target=1 << 20,
             max_block_bytes=8 << 20):
    """CALayer forward.

    x_nchw: (N, C, H, W)
    w1: (Cr, C)  (Conv2d(C, Cr, 1) weight squeezed), b1: (Cr,)
    w2: (C, Cr)  (Conv2d(Cr, C, 1) weight squeezed), b2: (C,)
    """
    N, C, H, W = x_nchw.shape
    Cr = w1.shape[0]
    HW = H * W
    inv_hw = 1.0 / float(HW)

    # Tiny weight preprocessing (done once, outside the kernel); MLP always in f32.
    w1t = jnp.transpose(w1.astype(jnp.float32), (1, 0))   # (C, Cr)
    b1r = b1.astype(jnp.float32).reshape(1, Cr)
    w2f = w2.astype(jnp.float32)                           # (C, Cr)
    b2c = b2.astype(jnp.float32).reshape(C, 1)

    x2d = x_nchw.reshape(N, C, HW)   # free contiguous reshape, stays NCHW order
    itemsize = jnp.dtype(x_nchw.dtype).itemsize
    per_image_bytes = C * _round_up(HW, 128) * itemsize

    if per_image_bytes <= max_block_bytes:
        out2d = _ca_layer_fused(x2d, w1t, b1r, w2f, b2c, inv_hw,
                                block_bytes_target, max_block_bytes)
    else:
        out2d = _ca_layer_strips(x2d, w1t, b1r, w2f, b2c, inv_hw, max_block_bytes)

    return out2d.reshape(N, C, H, W)


def _reference(x, w1, b1, w2, b2):
    # Pure-JAX reference matching PyTorch CALayer.forward.
    p = jnp.mean(x.astype(jnp.float32), axis=(2, 3))       # (N, C)
    t1 = jnp.maximum(p @ w1.T + b1[None, :], 0.0)          # (N, Cr)
    t2 = t1 @ w2.T + b2[None, :]                           # (N, C)
    y = jax.nn.sigmoid(t2)
    return x.astype(jnp.float32) * y[:, :, None, None]


if __name__ == "__main__":
    key = jax.random.PRNGKey(0)
    kx, k1, kb1, k2, kb2 = jax.random.split(key, 5)

    N, C, H, W = 2, 32, 16, 16
    reduction = 16
    Cr = C // reduction                     # = 2

    x = jax.random.normal(kx, (N, C, H, W), jnp.float32)
    w1 = jax.random.normal(k1, (Cr, C), jnp.float32) * (1.0 / math.sqrt(C))
    b1 = jax.random.normal(kb1, (Cr,), jnp.float32) * 0.1
    w2 = jax.random.normal(k2, (C, Cr), jnp.float32) * (1.0 / math.sqrt(Cr))
    b2 = jax.random.normal(kb2, (C,), jnp.float32) * 0.1

    ref = _reference(x, w1, b1, w2, b2)

    # Tolerances are slightly loose because the sigmoid uses the EUP approx reciprocal.
    # 1) Fused single-pass path (batched blocks).
    out = jax.block_until_ready(ca_layer(x, w1, b1, w2, b2))
    assert out.shape == (N, C, H, W)
    assert jnp.allclose(out, ref, atol=2e-4, rtol=5e-3), "fused path mismatch"

    # 2) Strip-mined two-pass path (forced via a tiny per-block budget).
    out_s = jax.block_until_ready(ca_layer(x, w1, b1, w2, b2, max_block_bytes=16 * 1024))
    assert jnp.allclose(out_s, ref, atol=2e-4, rtol=5e-3), "strip path mismatch"

    # 3) Non-multiple-of-128 spatial size (lane-padding path).
    xo = jax.random.normal(kx, (2, C, 10, 10), jnp.float32)
    ref_o = _reference(xo, w1, b1, w2, b2)
    out_o = jax.block_until_ready(ca_layer(xo, w1, b1, w2, b2))
    assert jnp.allclose(out_o, ref_o, atol=2e-4, rtol=5e-3), "padded path mismatch"

    # 4) bf16 activations (half HBM traffic); pool/MLP/gate still accumulated in f32.
    out_bf = jax.block_until_ready(ca_layer(x.astype(jnp.bfloat16), w1, b1, w2, b2))
    assert out_bf.dtype == jnp.bfloat16
    assert jnp.allclose(out_bf.astype(jnp.float32), ref, atol=5e-2, rtol=5e-2), "bf16 mismatch"

    print("KERNEL_OK")
</pallas_src>

<mosaic_0001>
module attributes {stable_mosaic.version = 11 : i64} {
  func.func @_ca_fused_kernel(%arg0: i32, %arg1: memref<1x32x256xf32, #tpu.memory_space<vmem>>, %arg2: memref<32x2xf32, #tpu.memory_space<vmem>>, %arg3: memref<1x2xf32, #tpu.memory_space<vmem>>, %arg4: memref<32x2xf32, #tpu.memory_space<vmem>>, %arg5: memref<32x1xf32, #tpu.memory_space<vmem>>, %arg6: memref<1x32x256xf32, #tpu.memory_space<vmem>>) attributes {dimension_semantics = [#tpu.dimension_semantics<parallel>], iteration_bounds = array<i64: 2>, scalar_prefetch = 0 : i64, scratch_operands = 0 : i64, tpu.core_type = #tpu.core_type<tc>, window_params = [{transform_indices = @transform_0, window_bounds = array<i64: 1, 32, 256>}, {pipeline_mode = #tpu.pipeline_mode<synchronous>, transform_indices = @transform_1, window_bounds = array<i64: 32, 2>}, {pipeline_mode = #tpu.pipeline_mode<synchronous>, transform_indices = @transform_2, window_bounds = array<i64: 1, 2>}, {pipeline_mode = #tpu.pipeline_mode<synchronous>, transform_indices = @transform_3, window_bounds = array<i64: 32, 2>}, {pipeline_mode = #tpu.pipeline_mode<synchronous>, transform_indices = @transform_4, window_bounds = array<i64: 32, 1>}, {transform_indices = @transform_5, window_bounds = array<i64: 1, 32, 256>}]} {
    %c0 = arith.constant 0 : index
    %c0_0 = arith.constant 0 : index
    %c0_1 = arith.constant 0 : index
    %0 = vector.load %arg1[%c0, %c0_0, %c0_1] : memref<1x32x256xf32, #tpu.memory_space<vmem>>, vector<1x32x256xf32>
    %cst = arith.constant dense<0.000000e+00> : vector<1x32xf32>
    %1 = vector.multi_reduction <add>, %0, %cst [2] : vector<1x32x256xf32> to vector<1x32xf32>
    %2 = vector.shape_cast %1 : vector<1x32xf32> to vector<1x32x1xf32>
    %cst_2 = arith.constant 3.906250e-03 : f32
    %3 = vector.broadcast %cst_2 : f32 to vector<1x32x1xf32>
    %4 = arith.mulf %2, %3 : vector<1x32x1xf32>
    %c0_3 = arith.constant 0 : index
    %c0_4 = arith.constant 0 : index
    %5 = vector.load %arg2[%c0_3, %c0_4] : memref<32x2xf32, #tpu.memory_space<vmem>>, vector<32x2xf32>
    %6 = vector.shape_cast %5 : vector<32x2xf32> to vector<1x32x2xf32>
    %7 = vector.broadcast %4 : vector<1x32x1xf32> to vector<1x32x2xf32>
    %8 = arith.mulf %6, %7 : vector<1x32x2xf32>
    %cst_5 = arith.constant dense<0.000000e+00> : vector<1x2xf32>
    %9 = vector.multi_reduction <add>, %8, %cst_5 [1] : vector<1x32x2xf32> to vector<1x2xf32>
    %10 = vector.shape_cast %9 : vector<1x2xf32> to vector<1x1x2xf32>
    %c0_6 = arith.constant 0 : index
    %c0_7 = arith.constant 0 : index
    %11 = vector.load %arg3[%c0_6, %c0_7] : memref<1x2xf32, #tpu.memory_space<vmem>>, vector<1x2xf32>
    %12 = vector.shape_cast %11 : vector<1x2xf32> to vector<1x1x2xf32>
    %13 = arith.addf %10, %12 : vector<1x1x2xf32>
    %cst_8 = arith.constant 0.000000e+00 : f32
    %14 = vector.broadcast %cst_8 : f32 to vector<1x1x2xf32>
    %15 = arith.maximumf %13, %14 : vector<1x1x2xf32>
    %c0_9 = arith.constant 0 : index
    %c0_10 = arith.constant 0 : index
    %16 = vector.load %arg4[%c0_9, %c0_10] : memref<32x2xf32, #tpu.memory_space<vmem>>, vector<32x2xf32>
    %17 = vector.shape_cast %16 : vector<32x2xf32> to vector<1x32x2xf32>
    %18 = vector.broadcast %15 : vector<1x1x2xf32> to vector<1x32x2xf32>
    %19 = arith.mulf %17, %18 : vector<1x32x2xf32>
    %cst_11 = arith.constant dense<0.000000e+00> : vector<1x32xf32>
    %20 = vector.multi_reduction <add>, %19, %cst_11 [2] : vector<1x32x2xf32> to vector<1x32xf32>
    %21 = vector.shape_cast %20 : vector<1x32xf32> to vector<1x32x1xf32>
    %c0_12 = arith.constant 0 : index
    %c0_13 = arith.constant 0 : index
    %22 = vector.load %arg5[%c0_12, %c0_13] : memref<32x1xf32, #tpu.memory_space<vmem>>, vector<32x1xf32>
    %23 = vector.shape_cast %22 : vector<32x1xf32> to vector<1x32x1xf32>
    %24 = arith.addf %21, %23 : vector<1x32x1xf32>
    %cst_14 = arith.constant 0.000000e+00 : f32
    %25 = vector.broadcast %cst_14 : f32 to vector<1x32x1xf32>
    %26 = arith.subf %25, %24 : vector<1x32x1xf32>
    %27 = math.exp %26 : vector<1x32x1xf32>
    %cst_15 = arith.constant 1.000000e+00 : f32
    %28 = vector.broadcast %cst_15 : f32 to vector<1x32x1xf32>
    %29 = arith.addf %28, %27 : vector<1x32x1xf32>
    %30 = tpu.reciprocal %29 {approx = true} : vector<1x32x1xf32> -> vector<1x32x1xf32>
    %c0_16 = arith.constant 0 : index
    %c0_17 = arith.constant 0 : index
    %c0_18 = arith.constant 0 : index
    %31 = vector.load %arg1[%c0_16, %c0_17, %c0_18] : memref<1x32x256xf32, #tpu.memory_space<vmem>>, vector<1x32x256xf32>
    %32 = vector.broadcast %30 : vector<1x32x1xf32> to vector<1x32x256xf32>
    %33 = arith.mulf %31, %32 : vector<1x32x256xf32>
    %c0_19 = arith.constant 0 : index
    %c0_20 = arith.constant 0 : index
    %c0_21 = arith.constant 0 : index
    %34 = vector.load %arg6[%c0_19, %c0_20, %c0_21] : memref<1x32x256xf32, #tpu.memory_space<vmem>>, vector<1x32x256xf32>
    tpu.vector_store %arg6[%c0_19, %c0_20, %c0_21], %33 {strides = array<i32>} : memref<1x32x256xf32, #tpu.memory_space<vmem>>, vector<1x32x256xf32>,
    return
  }
  func.func @transform_0(%arg0: i32) -> (i32, i32, i32) {
    %c0_i32 = arith.constant 0 : i32
    %c0_i32_0 = arith.constant 0 : i32
    %c0_i32_1 = arith.constant 0 : i32
    return %arg0, %c0_i32, %c0_i32_0 : i32, i32, i32
  }
  func.func @transform_1(%arg0: i32) -> (i32, i32) {
    %c0_i32 = arith.constant 0 : i32
    %c0_i32_0 = arith.constant 0 : i32
    %c0_i32_1 = arith.constant 0 : i32
    return %c0_i32, %c0_i32_0 : i32, i32
  }
  func.func @transform_2(%arg0: i32) -> (i32, i32) {
    %c0_i32 = arith.constant 0 : i32
    %c0_i32_0 = arith.constant 0 : i32
    %c0_i32_1 = arith.constant 0 : i32
    return %c0_i32, %c0_i32_0 : i32, i32
  }
  func.func @transform_3(%arg0: i32) -> (i32, i32) {
    %c0_i32 = arith.constant 0 : i32
    %c0_i32_0 = arith.constant 0 : i32
    %c0_i32_1 = arith.constant 0 : i32
    return %c0_i32, %c0_i32_0 : i32, i32
  }
  func.func @transform_4(%arg0: i32) -> (i32, i32) {
    %c0_i32 = arith.constant 0 : i32
    %c0_i32_0 = arith.constant 0 : i32
    %c0_i32_1 = arith.constant 0 : i32
    return %c0_i32, %c0_i32_0 : i32, i32
  }
  func.func @transform_5(%arg0: i32) -> (i32, i32, i32) {
    %c0_i32 = arith.constant 0 : i32
    %c0_i32_0 = arith.constant 0 : i32
    %c0_i32_1 = arith.constant 0 : i32
    return %arg0, %c0_i32, %c0_i32_0 : i32, i32, i32
  }
}

</mosaic_0001>

<bundles_post_ra>
// kernel: tpu_custom_call.1
= control target key start
LH: loop header
LB: loop body
LE: loop exit
PB: predicated region body
PF: predicated region fallthrough
CT: control target
= control target key end

     0   :  { %10 = vsyncpa [#allocation3], 0  ;;  %s932_s0 = inlined_call_operand.hbm [shape: f32[2,32,256], index: 0, kind: input, shape index: {}]   ;;  %s933_s1 = inlined_call_operand.vmem [shape: f32[32,2], index: 1, kind: input, shape index: {}]   ;;  %s934_s2 = inlined_call_operand.vmem [shape: f32[1,2], index: 2, kind: input, shape index: {}]   ;;  %s935_s3 = inlined_call_operand.vmem [shape: f32[32,2], index: 3, kind: input, shape index: {}]   ;;  %s936_s4 = inlined_call_operand.vmem [shape: f32[32,1], index: 4, kind: input, shape index: {}]   ;;  %s937_s5 = inlined_call_operand.hbm [shape: f32[2,32,256], index: 5, kind: output, shape index: {}]  }
   0x1   :  { %12 = vsyncpa [#allocation3 + $0x1], 0 }
   0x2   :  { %13 = vsyncpa [#allocation4], 0 }
   0x3   :  { %15 = vsyncpa [#allocation4 + $0x1], 0  ;;  %s687_s18 = smov 0   ;;  %s689_s19 = smov 0  }
   0x4   :  { %s691_s20 = smov 0   ;;  %s693_s21 = smov 0  }
   0x5 LB: > { %s708_s22 = sadd.s32 4294967295, %s648_s21   ;;  %s467_s23 = sadd.s32 4294967294, %s648_s21   ;;  %s648_s21 = sphi %s693_s21, %s950_s21   ;;  %s644_s20 = sphi %s691_s20, %s949_s20   ;;  %s640_s19 = sphi %s689_s19, %s948_s19   ;;  %s636_s18 = sphi %s687_s18, %s947_s18  }
   0x6   : > { %s712_s24 = sadd.s32 1, %s648_s21   ;;  %s28_s25 = sadd.s32 1, %s644_s20 }
   0x7   : > { %s25_s26 = ssub.s32 %s648_s21, %s712_s24  ;;  %p35_p0 = scmp.ne.s32.totalorder %s644_s20, %s640_s19 }
   0x8   : > { %p26_p1 = scmp.eq.s32.totalorder %s25_s26, 0  ;;  %p36_p2 = scmp.eq.s32.totalorder %s648_s21, 0 }
   0x9   : > { %p41_p3 = scmp.ne.s32.totalorder %s640_s19, %s636_s18  ;;  %p42_p4 = scmp.eq.s32.totalorder %s708_s22, 0 }
   0xa   : > { %s724_s27 = scalar_select %p26_p1, %s644_s20, %s28_s25  }
   0xb   : > { %p726_p5 = por %p36_p2, %p35_p0  ;;  %p730_p6 = por %p42_p4, %p41_p3 }
   0xc   : > { %p149_p7 = scmp.eq.s32.totalorder %s708_s22, 1  ;;  %p155_p8 = scmp.eq.s32.totalorder %s467_s23, 1 }
   0xd   : > { %p495_p10 = scmp.lt.s32.totalorder %s648_s21, 2  ;;  %s187_s7 = sand.u32 1, %s644_s20  }
   0xe   : > { %p737_p11 = por %p149_p7, %p35_p0  ;;  %p741_p12 = por %p155_p8, %p41_p3 }
   0xf   : > { %s481_s8 = sshll.u32 %s648_s21, 10  ;;  %s470_s9 = sshll.u32 %s187_s7, 6 }
  0x10   : > { %s941_s30 = scalar_select %p737_p11, 1, 0 }
  0x11   : > { %s942_s6 = scalar_select %p741_p12, 1, 0 }
  0x12   : > { %s750_s12 = scalar_lea.hbm %s932_s0, %s481_s8  ;;  %s191_s13 = scalar_lea.vmem [#allocation2], %s470_s9 }
  0x13   : > { %s198_s14 = sshll.u32 %s191_s13, 4  ;;  %p754_p13 = pnand %p495_p10, %p726_p5  ;;  %s758_s14 = int_to_ptr.vmem [resolvable:$true] %s198_s14 }
  0x14   : > { %s760_s16 = scalar_lea.sflag [#allocation3], %s187_s7  ;;  %s552_s17 = scalar_lea.hbm %s750_s12, 1024 }
  0x15   : > { %p553_p0 = scmp.ne.s32.totalorder %s750_s12, %s552_s17  ;;  %p554_p1 = pneg %p754_p13 }
  0x16   : > { %s557_s26 = scalar_lea.hbm %s932_s0, 2048  ;;  %p558_p4 = scmp.lt.u32.totalorder %s750_s12, %s932_s0 }
  0x17   : > { %p555_p2 = pnand %p554_p1, %p553_p0  ;;  %p559_p5 = scmp.lt.u32.totalorder %s557_s26, %s552_s17 }
  0x18   : > { %p561_p8 = scmp.lt.u32.totalorder %s552_s17, %s750_s12 }
  0x19   : > { %p556_p3 = pneg %p555_p2  ;;  %p560_p7 = por %p559_p5, %p558_p4 }
  0x1b   : > { %p562_p10 = por %p561_p8, %p560_p7 }
  0x1d   : > { %p563_p9 = pnand %p562_p10, %p556_p3 }
  0x1f   : > { %566 = shalt.err (!%p563_p9)
}
  0x20   : > { %s567_s7 = scalar_lea.vmem %s758_s14, 1024  ;;  %s650_s9 = smov [#allocation2]  }
  0x21   : > { %p568_p0 = scmp.ne.s32.totalorder %s758_s14, %s567_s7  ;;  %s572_s10 = sshll.u32 %s650_s9, 4  ;;  %s573_s10 = int_to_ptr.vmem [resolvable:$false] %s572_s10 }
  0x22   : > { %s574_s11 = scalar_lea.vmem %s573_s10, 2048  ;;  %p575_p11 = scmp.lt.s32.totalorder %s758_s14, %s573_s10 }
  0x23   : > { %p570_p2 = pnand %p568_p0, %p554_p1  ;;  %p576_p4 = scmp.lt.s32.totalorder %s574_s11, %s567_s7 }
  0x25   : > { %p571_p12 = pneg %p570_p2  ;;  %p577_p5 = por %p576_p4, %p575_p11 }
  0x27   : > { %p578_p7 = pnand %p577_p5, %p571_p12 }
  0x29   : > { %581 = shalt.err (!%p578_p7)
}
  0x2a   : > { %s651_s13 = smov 256   ;;  %s652_s17 = smov 16  }
  0x2b   : > { %490 = dma.hbm_to_vmem [thread:$0]  (!%p754_p13), %s750_s12, 1024, %s758_s14, %s760_s16, %s651_s13, %s651_s13, %s652_s17  }
  0x2c   : > { %p473_p9 = scmp.ge.s32.totalorder %s648_s21, 1  ;;  %p206_p1 = scmp.lt.s32.totalorder %s648_s21, 3 }
  0x2e   : > { %p207_p3 = pnand %p473_p9, %p206_p1 }
  0x2f   : > { %s791_s23 = sand.u32 (!%p207_p3), 1, %s640_s19  }
  0x30   : > { %210 = sbr.rel (%p207_p3) target bundleno = 563 (0x233), region = 40  ;;  %s474_s25 = sshll.u32 (!%p207_p3), %s791_s23, 6 }
  0x31   : > { %s213_s26 = scalar_lea.sflag (!%p207_p3), [#allocation3], %s791_s23  ;;  %s216_s28 = scalar_lea.vmem (!%p207_p3), [#allocation2], %s474_s25 }
  0x37   : > { %627 = dma.done.wait (%p730_p6), %s213_s26, 1024  }
  0x38   : > { %629 = vsyncadd (%p730_p6), %s213_s26, 4294966272  ;;  %v801_v0 = vld [vmem:[%s216_s28] sm:$0xff]  ;;  %v803_v1 = vld [vmem:[%s216_s28 + $0x8] sm:$0xff]  ;;  %vm275_vm0 = vcmask 15360   ;;  %v296_v38 = vlaneseq  ;;  %v653_v60 = vmov 0   ;;  %s242_s26 = scalar_lea.vmem [#allocation5], %s474_s25 }
  0x39   : > { %v805_v2 = vld [vmem:[%s216_s28 + $0x20] sm:$0xff]  ;;  %v251_v3 = vadd.f32 %v803_v1, %v801_v0  ;;  %v809_v4 = vld [vmem:[%s216_s28 + $0x28] sm:$0xff]  ;;  %v811_v5 = vld [vmem:[%s216_s28 + $0x10] sm:$0xff]  ;;  %535 = vset.pattern.permute.xlu1 %v653_v60  ;;  %534 = vset.pattern.permute.xlu0 %v653_v60  ;;  %s482_s29 = sshll.u32 %s708_s22, 10  ;;  %s381_s22 = scalar_lea.sflag [#allocation4], %s791_s23 }
  0x3a   : > { %v813_v6 = vld [vmem:[%s216_s28 + $0x18] sm:$0xff]  ;;  %v257_v7 = vadd.f32 %v809_v4, %v805_v2  ;;  %v817_v8 = vld [vmem:[%s216_s28 + $0x30] sm:$0xff]  ;;  %v267_v15 = vld [vmem:[%s933_s1] sm:$0xff]  ;;  %v297_v41 = vshrl.u32 %v296_v38, 7  ;;  %s886_s14 = scalar_lea.hbm %s937_s5, %s482_s29  ;;  %p944_p11 = scmp.ne.s32.totalorder %s941_s30, 0 }
  0x3b   : > { %v819_v9 = vld [vmem:[%s216_s28 + $0x38] sm:$0xff]  ;;  %252 = vadd.xlane.f32.xlu0 %v251_v3  ;;  %v254_v10 = vadd.f32 %v813_v6, %v811_v5  ;;  %v269_v17 = vld [vmem:[%s933_s1 + $0x10] sm:$0xff]  ;;  %v268_v18 = vld [vmem:[%s933_s1 + $0x8] sm:$0xff]  ;;  %s394_s28 = sshll.u32 %s242_s26, 4  ;;  %s654_s16 = smov [#allocation5]   ;;  %s881_s28 = int_to_ptr.vmem [resolvable:$true] %s394_s28 }
  0x3c   : > { %258 = vadd.xlane.f32.xlu1 %v257_v7  ;;  %v260_v11 = vadd.f32 %v819_v9, %v817_v8  ;;  %v270_v22 = vld [vmem:[%s933_s1 + $0x18] sm:$0xff]  ;;  %v289_v42 = vld [vmem:[%s934_s2] sm:$0x1]  ;;  %v298_v45 = vsub.s32 0, %v297_v41  ;;  %v293_v47 = vld [vmem:[%s935_s3 + $0x8] sm:$0xff]  ;;  %s582_s15 = scalar_lea.vmem %s881_s28, 1024 }
  0x3d   : > { %v292_v48 = vld [vmem:[%s935_s3] sm:$0xff]  ;;  %v295_v50 = vld [vmem:[%s935_s3 + $0x18] sm:$0xff]  ;;  %v294_v51 = vld [vmem:[%s935_s3 + $0x10] sm:$0xff]  ;;  %p583_p6 = scmp.ne.s32.totalorder %s881_s28, %s582_s15  ;;  %s586_s8 = sshll.u32 %s654_s16, 4  ;;  %s587_s8 = int_to_ptr.vmem [resolvable:$false] %s586_s8 }
  0x3e   : > { %v317_v61 = vld [vmem:[%s936_s4 + $0x8] sm:$0xff]  ;;  %v316_v62 = vld [vmem:[%s936_s4] sm:$0xff]  ;;  %s588_s7 = scalar_lea.vmem %s587_s8, 2048  ;;  %p589_p8 = scmp.lt.s32.totalorder %s881_s28, %s587_s8 }
  0x3f   : > { %255 = vadd.xlane.f32.xlu0 %v254_v10  ;;  %p584_p12 = pnand %p583_p6, %p944_p11  ;;  %p590_p10 = scmp.lt.s32.totalorder %s588_s7, %s582_s15 }
  0x40   : > { %261 = vadd.xlane.f32.xlu1 %v260_v11  ;;  %v319_v11 = vld [vmem:[%s936_s4 + $0x18] sm:$0xff] }
  0x41   : > { %p585_p13 = pneg %p584_p12  ;;  %p591_p0 = por %p590_p10, %p589_p8 }
  0x43   : > { %p592_p2 = pnand %p591_p0, %p585_p13 }
  0xc8   : > { %v253_v12 = vpop.xlane.xlu0 %252 }
  0xc9   : > { %v263_v13 = vmul.f32 0.00390625, %v253_v12  ;;  %v259_v14 = vpop.xlane.xlu1 %258  ;;  %v318_v12 = vld [vmem:[%s936_s4 + $0x10] sm:$0xff] }
  0xca   : > { %v265_v16 = vmul.f32 0.00390625, %v259_v14 }
  0xcb   : > { %v271_v20 = vmul.f32 %v267_v15, %v263_v13 }
  0xcc   : > { %v256_v19 = vpop.xlane.xlu0 %255  ;;  %v273_v25 = vmul.f32 %v269_v17, %v265_v16 }
  0xcd   : > { %v264_v21 = vmul.f32 0.00390625, %v256_v19  ;;  %v262_v23 = vpop.xlane.xlu1 %261  ;;  %v276_v28 = vsel %vm275_vm0, %v271_v20, 0.0 }
  0xce   : > { %v266_v24 = vmul.f32 0.00390625, %v262_v23  ;;  %v279_v31 = vsel %vm275_vm0, %v273_v25, 0.0 }
  0xcf   : > { %v272_v26 = vmul.f32 %v268_v18, %v264_v21 }
  0xd0   : > { %v274_v27 = vmul.f32 %v270_v22, %v266_v24 }
  0xd1   : > { %v277_v29 = vsel %vm275_vm0, %v272_v26, 0.0 }
  0xd2   : > { %v278_v30 = vadd.f32 %v277_v29, %v276_v28  ;;  %v281_v32 = vsel %vm275_vm0, %v274_v27, 0.0 }
  0xd4   : > { %v280_v33 = vadd.f32 %v279_v31, %v278_v30 }
  0xd6   : > { %v282_v34 = vadd.f32 %v281_v32, %v280_v33 }
  0xd8   : > { %v283_v35 = vrot.slane %v282_v34, 4 }
  0xda   : > { %v284_v36 = vadd.f32 %v283_v35, %v282_v34 }
  0xdc   : > { %v285_v37 = vrot.slane %v284_v36, 2 }
  0xde   : > { %v286_v39 = vadd.f32 %v285_v37, %v284_v36 }
  0xe0   : > { %v287_v40 = vrot.slane %v286_v39, 1 }
  0xe2   : > { %v288_v43 = vadd.f32 %v287_v40, %v286_v39 }
  0xe4   : > { %v290_v44 = vadd.f32 %v289_v42, %v288_v43 }
  0xe6   : > { %v291_v46 = vmax.f32 %v290_v44, 0.0 }
  0xe8   : > { %v299_v49 = vrot.slane %v291_v46, %v298_v45 }
  0xea   : > { %v301_v52 = vmul.f32 %v299_v49, %v293_v47  ;;  %v300_v53 = vmul.f32 %v299_v49, %v292_v48  ;;  %v303_v56 = vmul.f32 %v299_v49, %v295_v50  ;;  %v302_v57 = vmul.f32 %v299_v49, %v294_v51 }
  0xec   : > { %v307_v54 = vsel %vm275_vm0, %v301_v52, 0.0  ;;  %v304_v55 = vsel %vm275_vm0, %v300_v53, 0.0  ;;  %v313_v58 = vsel %vm275_vm0, %v303_v56, 0.0  ;;  %v310_v59 = vsel %vm275_vm0, %v302_v57, 0.0 }
  0xed   : > { %308 = vadd.xlane.f32.xlu1 %v307_v54  ;;  %305 = vadd.xlane.f32.xlu0 %v304_v55 }
  0xf1   : > { %314 = vadd.xlane.f32.xlu1 %v313_v58  ;;  %311 = vadd.xlane.f32.xlu0 %v310_v59 }
 0x17a   : > { %v309_v63 = vpop.xlane.xlu1 %308  ;;  %v306_v3 = vpop.xlane.xlu0 %305 }
 0x17b   : > { %v321_v7 = vadd.f32 %v317_v61, %v309_v63  ;;  %v320_v10 = vadd.f32 %v316_v62, %v306_v3 }
 0x17d   : > { %v325_v13 = vsub.f32 0.0, %v321_v7  ;;  %v324_v14 = vsub.f32 0.0, %v320_v10 }
 0x17e   : > { %v315_v15 = vpop.xlane.xlu1 %314  ;;  %v312_v16 = vpop.xlane.xlu0 %311 }
 0x17f   : > { %v330_v17 = vmul.f32 1.442695, %v325_v13  ;;  %v328_v18 = vmul.f32 1.442695, %v324_v14  ;;  %v323_v19 = vadd.f32 %v319_v11, %v315_v15  ;;  %v322_v20 = vadd.f32 %v318_v12, %v312_v16 }
 0x181   : > { %536 = vpow2.f32 %v330_v17  ;;  %v327_v21 = vsub.f32 0.0, %v323_v19  ;;  %v326_v22 = vsub.f32 0.0, %v322_v20 }
 0x182   : > { %538 = vpow2.f32 %v328_v18 }
 0x183   : > { %v334_v23 = vmul.f32 1.442695, %v327_v21  ;;  %v332_v24 = vmul.f32 1.442695, %v326_v22 }
 0x185   : > { %540 = vpow2.f32 %v334_v23 }
 0x186   : > { %542 = vpow2.f32 %v332_v24 }
 0x18b   : > { %v537_v25 = vpop.eup %536 }
 0x18c   : > { %v539_v26 = vpop.eup %538  ;;  %v337_v27 = vadd.f32 1.0, %v537_v25 }
 0x18d   : > { %v336_v28 = vadd.f32 1.0, %v539_v26 }
 0x18e   : > { %544 = vrcp.f32 %v337_v27 }
 0x18f   : > { %v541_v29 = vpop.eup %540  ;;  %546 = vrcp.f32 %v336_v28 }
 0x190   : > { %v543_v30 = vpop.eup %542  ;;  %v339_v32 = vadd.f32 1.0, %v541_v29 }
 0x191   : > { %v338_v31 = vadd.f32 1.0, %v543_v30 }
 0x193   : > { %548 = vrcp.f32 %v338_v31 }
 0x194   : > { %550 = vrcp.f32 %v339_v32 }
 0x198   : > { %v545_v33 = vpop.eup %544 }
 0x199   : > { %v547_v34 = vpop.eup %546  ;;  %351 = vperm.xlu1 %535, %v545_v33  }
 0x19a   : > { %346 = vperm.xlu0 %534, %v547_v34  }
 0x19d   : > { %v549_v35 = vpop.eup %548 }
 0x19e   : > { %356 = vperm.xlu1 %535, %v549_v35   ;;  %v551_v36 = vpop.eup %550 }
 0x1a2   : > { %361 = vperm.xlu1 %535, %v551_v36  }
 0x218   : > { %v352_v37 = vpop.permute.xlu1 %351 }
 0x219   : > { %v366_v38 = vmul.f32 %v352_v37, %v811_v5  ;;  %v367_v39 = vmul.f32 %v352_v37, %v813_v6  ;;  %v347_v40 = vpop.permute.xlu0 %346 }
 0x21a   : > { %v364_v41 = vmul.f32 %v347_v40, %v801_v0  ;;  %v365_v42 = vmul.f32 %v347_v40, %v803_v1 }
 0x21b   : > { %374 = vst [vmem:[%s242_s26 + $0x10] sm:$0xff] %v366_v38  ;;  %375 = vst [vmem:[%s242_s26 + $0x18] sm:$0xff] %v367_v39 }
 0x21c   : > { %372 = vst [vmem:[%s242_s26] sm:$0xff] %v364_v41  ;;  %373 = vst [vmem:[%s242_s26 + $0x8] sm:$0xff] %v365_v42 }
 0x21d   : > { %v357_v43 = vpop.permute.xlu1 %356 }
 0x21e   : > { %v368_v44 = vmul.f32 %v357_v43, %v805_v2  ;;  %v369_v5 = vmul.f32 %v357_v43, %v809_v4 }
 0x220   : > { %376 = vst [vmem:[%s242_s26 + $0x20] sm:$0xff] %v368_v44  ;;  %377 = vst [vmem:[%s242_s26 + $0x28] sm:$0xff] %v369_v5 }
 0x221   : > { %v362_v0 = vpop.permute.xlu1 %361 }
 0x222   : > { %v370_v1 = vmul.f32 %v362_v0, %v817_v8  ;;  %v371_v2 = vmul.f32 %v362_v0, %v819_v9 }
 0x224   : > { %378 = vst [vmem:[%s242_s26 + $0x30] sm:$0xff] %v370_v1  ;;  %379 = vst [vmem:[%s242_s26 + $0x38] sm:$0xff] %v371_v2 }
 0x225   : > { %595 = shalt.err (!%p592_p2)
}
 0x226   : > { %s596_s9 = scalar_lea.hbm %s886_s14, 1024  ;;  %s600_s13 = scalar_lea.hbm %s937_s5, 2048 }
 0x227   : > { %p597_p4 = scmp.ne.s32.totalorder %s886_s14, %s596_s9  ;;  %p601_p9 = scmp.lt.u32.totalorder %s886_s14, %s937_s5 }
 0x228   : > { %p602_p1 = scmp.lt.u32.totalorder %s600_s13, %s596_s9  ;;  %p604_p6 = scmp.lt.u32.totalorder %s596_s9, %s886_s14 }
 0x229   : > { %p598_p5 = pnand %p597_p4, %p944_p11 }
 0x22a   : > { %p603_p3 = por %p602_p1, %p601_p9 }
 0x22b   : > { %p599_p7 = pneg %p598_p5 }
 0x22c   : > { %p605_p12 = por %p604_p6, %p603_p3 }
 0x22e   : > { %p606_p13 = pnand %p605_p12, %p599_p7 }
 0x230   : > { %609 = shalt.err (!%p606_p13)
}
 0x231   : > { %s655_s29 = smov 256   ;;  %s656_s25 = smov 16  }
 0x232   : > { %485 = dma.vmem_to_hbm [thread:$0]  (%p944_p11), %s881_s28, 1024, %s886_s14, %s381_s22, %s655_s29, %s655_s29, %s656_s25  }
 0x233 PF: > { %s409_s12 = sand.u32 1, %s636_s18   ;;  %p945_p8 = scmp.ne.s32.totalorder %s942_s6, 0 }
 0x234   : > { %p946_p10 = scmp.ge.s32.totalorder %s648_s21, 2  ;;  %s410_s15 = scalar_lea.sflag [#allocation4], %s409_s12 }
 0x236   : > { %p492_p0 = pnand %p946_p10, %p945_p8 }
 0x238   : > { %631 = dma.done.wait (!%p492_p0), %s410_s15, 1024  }
 0x239   : > { %633 = vsyncadd (!%p492_p0), %s410_s15, 4294966272  ;;  %p18_p2 = scmp.ge.s32.totalorder %s712_s24, 4   ;;  %s947_s18 = smov %s640_s19 }
 0x23a   : > { %s948_s19 = smov %s644_s20  ;;  %s949_s20 = smov %s724_s27 }
 0x23b   : > { %s950_s21 = smov %s712_s24  ;;  %20 = sbr.rel (!%p18_p2) target bundleno = 5 (0x5), region = 85 }
 0x242   :  { %415 = vsyncpa [#allocation3], 1 }
 0x243   :  { %417 = vsyncpa [#allocation3 + $0x1], 1 }
 0x244   :  { %418 = vsyncpa [#allocation4], 1 }
 0x245   :  { %420 = vsyncpa [#allocation4 + $0x1], 1 }

</bundles_post_ra>
